<compile_context>
chip_gen: v5e
topology: v5e:2x2
jax: 0.10.0
libtpu: 0.0.40
codegen_flags: <defaults>
</compile_context>

<pallas_src>
import jax
import jax.numpy as jnp
from jax.experimental import pallas as pl
from jax.experimental.pallas import tpu as pltpu


def _round_up(x: int, m: int) -> int:
    return (x + m - 1) // m * m


def _vmem_capacity_bytes() -> int:
    try:
        return int(pltpu.get_tpu_info().vmem_capacity_bytes)
    except Exception:
        return 64 * 1024 * 1024  # conservative (v7x per-TC)


def _pick_tile(n: int, align: int, cap: int) -> int:
    """Aligned tile size <= cap, preferring exact divisors of n (no padding)."""
    n_aligned = _round_up(n, align)
    if n_aligned <= cap:
        return n_aligned
    for t in range(cap, align - 1, -align):
        if n % t == 0:
            return t
    cands = list(range(cap, align - 1, -align))
    return min(cands, key=lambda t: _round_up(n, t) - n)


# --------------------------- kernels ----------------------------------------

def _pe_kernel_resident(a_ref, w_ref, b_ref, o_ref):
    # Whole (K, E) weight resident in VMEM; one MXU dot + bias per M tile.
    acc = jnp.dot(a_ref[...], w_ref[...], preferred_element_type=jnp.float32)
    o_ref[...] = (acc + b_ref[...]).astype(o_ref.dtype)


def _pe_kernel_tiled_f32out(a_ref, w_ref, b_ref, o_ref):
    # Tiled reduction over K, accumulating directly into the f32 output block.
    k = pl.program_id(2)

    @pl.when(k == 0)
    def _():
        o_ref[...] = jnp.broadcast_to(b_ref[...], o_ref.shape)

    o_ref[...] += jnp.dot(a_ref[...], w_ref[...],
                          preferred_element_type=jnp.float32)


def _pe_kernel_tiled_acc(a_ref, w_ref, b_ref, o_ref, acc_ref):
    # Tiled reduction over K with an f32 scratch accumulator (narrow outputs).
    k = pl.program_id(2)

    @pl.when(k == 0)
    def _():
        acc_ref[...] = jnp.broadcast_to(b_ref[...], acc_ref.shape)

    acc_ref[...] += jnp.dot(a_ref[...], w_ref[...],
                            preferred_element_type=jnp.float32)

    @pl.when(k == pl.num_programs(2) - 1)
    def _():
        o_ref[...] = acc_ref[...].astype(o_ref.dtype)


# --------------------------- wrapper -----------------------------------------

def patch_embedding_forward(x, weight, bias, patch_size: int, *,
                            use_bf16_matmul: bool = False,
                            vmem_budget_bytes: int | None = None):
    """x: (B, C, H, W) NCHW; weight: (E, C, P, P); bias: (E,).

    Returns (B, (H//P)*(W//P), E), matching PyTorch PatchEmbedding.forward.
    """
    B, C, H, W = x.shape
    P = patch_size
    assert W % P == 0, "Input Image is not divisible by patch size"
    E = weight.shape[0]
    Hp, Wp = H // P, W // P
    # Conv with kernel == stride and padding=0 simply drops trailing rows that
    # do not form a full patch (the module only asserts divisibility on W).
    x = x[:, :, :Hp * P, :Wp * P]

    M = B * Hp * Wp
    K = C * P * P
    out_dtype = x.dtype

    compute_dtype = jnp.bfloat16 if use_bf16_matmul else x.dtype
    op_isize = jnp.dtype(compute_dtype).itemsize
    out_isize = jnp.dtype(out_dtype).itemsize
    m_align = 16 if compute_dtype == jnp.bfloat16 else 8

    # --- patch matrix (A) and pre-transposed flattened filters (K, E) --------
    # allow_input_fusion below lets XLA fuse this reshape/transpose into the
    # Pallas input DMA instead of materializing A in HBM.
    # TODO(synk): verify in HLO/xprof that the patch extraction actually fuses
    # (and that the fused DMA is not badly strided); if it materializes, emit A
    # in bf16 to halve the extra activation traffic.
    a = x.reshape(B, C, Hp, P, Wp, P).transpose(0, 2, 4, 1, 3, 5).reshape(M, K)
    a = a.astype(compute_dtype)
    wt = weight.reshape(E, K).T.astype(compute_dtype)   # (K, E): static, folded by XLA

    # --- VMEM budget (per-generation safe) -----------------------------------
    vmem_cap = _vmem_capacity_bytes()
    budget = (vmem_budget_bytes if vmem_budget_bytes is not None
              else min(vmem_cap // 2, 64 << 20))        # <=32 MiB v7x, <=64 MiB v5e/v6e

    # --- path selection: resident-W (common) vs. fully tiled fallback --------
    k_pad = _round_up(K, 128)
    n_pad = _round_up(E, 128)

    def resident_bytes(tm_):
        return (2 * tm_ * k_pad * op_isize      # A tile (double-buffered)
                + 2 * k_pad * n_pad * op_isize  # resident weights (2 bufs allocated)
                + 2 * tm_ * n_pad * out_isize   # output tile
                + 2 * n_pad * 4)                # bias

    cap = 512
    tm = _pick_tile(M, m_align, cap)
    while resident_bytes(tm) > budget and cap > m_align:
        cap = max(m_align, cap // 2)
        tm = _pick_tile(M, m_align, cap)
    use_resident = resident_bytes(tm) <= budget

    if use_resident:
        m_pad = _round_up(M, tm)
        grid = (m_pad // tm,)
        grid_spec = pltpu.PrefetchScalarGridSpec(
            num_scalar_prefetch=0,
            grid=grid,
            in_specs=[
                pl.BlockSpec((tm, k_pad), lambda i: (i, 0)),     # A tile (streamed)
                pl.BlockSpec((k_pad, n_pad), lambda i: (0, 0)),  # W: constant -> DMA'd once
                pl.BlockSpec((1, n_pad), lambda i: (0, 0)),      # bias: resident
            ],
            out_specs=pl.BlockSpec((tm, n_pad), lambda i: (i, 0)),
            scratch_shapes=[],
        )
        kernel = _pe_kernel_resident
        dim_sem = ("parallel",)   # M axis sharded across TensorCores (v7x megacore)
        est = resident_bytes(tm)
    else:
        # Rare: K*E too large for resident weights -> classic (M, N, K) tiling.
        tk = _pick_tile(K, 128, 512)
        tn = _pick_tile(E, 128, 256)
        tm = _pick_tile(M, m_align, 512)
        k_pad = _round_up(K, tk)
        n_pad = _round_up(E, tn)
        m_pad = _round_up(M, tm)
        f32_out = out_dtype == jnp.float32
        grid = (m_pad // tm, n_pad // tn, k_pad // tk)
        grid_spec = pltpu.PrefetchScalarGridSpec(
            num_scalar_prefetch=0,
            grid=grid,
            in_specs=[
                pl.BlockSpec((tm, tk), lambda i, j, k: (i, k)),
                pl.BlockSpec((tk, tn), lambda i, j, k: (k, j)),
                pl.BlockSpec((1, tn), lambda i, j, k: (0, j)),
            ],
            out_specs=pl.BlockSpec((tm, tn), lambda i, j, k: (i, j)),
            scratch_shapes=([] if f32_out
                            else [pltpu.VMEM((tm, tn), jnp.float32)]),
        )
        kernel = _pe_kernel_tiled_f32out if f32_out else _pe_kernel_tiled_acc
        dim_sem = ("parallel", "parallel", "arbitrary")
        est = (2 * (tm * tk + tk * tn) * op_isize + 2 * tm * tn * out_isize
               + 2 * tn * 4 + (0 if f32_out else tm * tn * 4))

    # --- zero padding (does not change the matmul; sliced off below) ---------
    if (m_pad, k_pad) != (M, K):
        a = jnp.pad(a, ((0, m_pad - M), (0, k_pad - K)))
    if (k_pad, n_pad) != (K, E):
        wt = jnp.pad(wt, ((0, k_pad - K), (0, n_pad - E)))
    bias2d = bias.astype(jnp.float32).reshape(1, E)
    if n_pad != E:
        bias2d = jnp.pad(bias2d, ((0, 0), (0, n_pad - E)))

    vmem_limit = int(min(max(32 << 20, est + (8 << 20)), vmem_cap))

    out = pl.pallas_call(
        kernel,
        out_shape=jax.ShapeDtypeStruct((m_pad, n_pad), out_dtype),
        grid_spec=grid_spec,
        compiler_params=pltpu.CompilerParams(
            dimension_semantics=dim_sem,
            vmem_limit_bytes=vmem_limit,
            allow_input_fusion=[True, False, False],
        ),
    )(a, wt, bias2d)

    if (m_pad, n_pad) != (M, E):
        out = out[:M, :E]     # skipped entirely (metadata-only) in common case
    return out.reshape(B, Hp * Wp, E)


# --------------------------- reference & tests --------------------------------

def _reference(x, weight, bias, patch_size):
    B, C, H, W = x.shape
    E = weight.shape[0]
    Hp, Wp = H // patch_size, W // patch_size
    patches = x.reshape(B, C, Hp, patch_size, Wp, patch_size)
    patches = patches.transpose(0, 2, 4, 1, 3, 5).reshape(B * Hp * Wp, -1)
    w = weight.reshape(E, -1).T
    out = patches.astype(jnp.float32) @ w.astype(jnp.float32) + bias
    return out.reshape(B, Hp * Wp, E).astype(x.dtype)


def _run_case(key, B, C, H, W, patch_size, embed_dim, *, x_dtype=jnp.float32,
              use_bf16_matmul=False, vmem_budget_bytes=None, atol=1e-4, rtol=1e-4):
    kx, kw, kb = jax.random.split(key, 3)
    x = jax.random.normal(kx, (B, C, H, W), dtype=x_dtype)
    weight = 0.02 * jax.random.normal(
        kw, (embed_dim, C, patch_size, patch_size), dtype=jnp.float32)
    bias = 0.01 * jax.random.normal(kb, (embed_dim,), dtype=jnp.float32)

    out = patch_embedding_forward(x, weight, bias, patch_size,
                                  use_bf16_matmul=use_bf16_matmul,
                                  vmem_budget_bytes=vmem_budget_bytes)
    out = jax.block_until_ready(out)

    ref = _reference(x, weight, bias, patch_size)
    num_patches = (H // patch_size) * (W // patch_size)
    assert out.shape == (B, num_patches, embed_dim), out.shape
    assert jnp.allclose(out, ref, atol=atol, rtol=rtol), (
        float(jnp.max(jnp.abs(out.astype(jnp.float32) - ref.astype(jnp.float32)))))


if __name__ == "__main__":
    key = jax.random.PRNGKey(0)
    k1, k2, k3, k4 = jax.random.split(key, 4)

    # 1) Common resident-weight path (in_channels=3, patch=16, small embed dim).
    _run_case(k1, B=2, C=3, H=32, W=32, patch_size=16, embed_dim=32)

    # 2) No-padding case: E % 128 == 0 and tm divides M -> output slice skipped.
    _run_case(k2, B=2, C=3, H=64, W=64, patch_size=16, embed_dim=128)

    # 3) Tiled multi-K fallback, f32 output accumulated directly into o_ref
    #    (forced by an artificially tiny VMEM budget; correctness-only at small shapes).
    _run_case(k3, B=2, C=3, H=32, W=32, patch_size=16, embed_dim=48,
              vmem_budget_bytes=256 * 1024)

    # 4) Tiled fallback with bf16 operands and bf16 output (scratch-accumulator kernel).
    _run_case(k4, B=2, C=3, H=32, W=32, patch_size=16, embed_dim=48,
              x_dtype=jnp.bfloat16, use_bf16_matmul=True,
              vmem_budget_bytes=256 * 1024, atol=3e-2, rtol=3e-2)

    print("KERNEL_OK")
</pallas_src>

<mosaic_0001>
module attributes {stable_mosaic.version = 11 : i64} {
  func.func @_pe_kernel_resident(%arg0: i32, %arg1: memref<8x768xf32, #tpu.memory_space<vmem>>, %arg2: memref<768x128xf32, #tpu.memory_space<vmem>>, %arg3: memref<1x128xf32, #tpu.memory_space<vmem>>, %arg4: memref<8x128xf32, #tpu.memory_space<vmem>>) attributes {dimension_semantics = [#tpu.dimension_semantics<parallel>], iteration_bounds = array<i64: 1>, scalar_prefetch = 0 : i64, scratch_operands = 0 : i64, tpu.core_type = #tpu.core_type<tc>, window_params = [{transform_indices = @transform_0, window_bounds = array<i64: 8, 768>}, {pipeline_mode = #tpu.pipeline_mode<synchronous>, transform_indices = @transform_1, window_bounds = array<i64: 768, 128>}, {pipeline_mode = #tpu.pipeline_mode<synchronous>, transform_indices = @transform_2, window_bounds = array<i64: 1, 128>}, {transform_indices = @transform_3, window_bounds = array<i64: 8, 128>}]} {
    %c0 = arith.constant 0 : index
    %c0_0 = arith.constant 0 : index
    %0 = vector.load %arg1[%c0, %c0_0] : memref<8x768xf32, #tpu.memory_space<vmem>>, vector<8x768xf32>
    %c0_1 = arith.constant 0 : index
    %c0_2 = arith.constant 0 : index
    %1 = vector.load %arg2[%c0_1, %c0_2] : memref<768x128xf32, #tpu.memory_space<vmem>>, vector<768x128xf32>
    %cst = arith.constant dense<0.000000e+00> : vector<8x128xf32>
    %2 = tpu.matmul %0, %1, %cst {dimension_numbers = #tpu.dot_dimension_numbers<[1], [0], [0], [1], [0, 0, 1, 1], [], []>} : vector<8x768xf32>, vector<768x128xf32>, vector<8x128xf32> -> vector<8x128xf32>
    %c0_3 = arith.constant 0 : index
    %c0_4 = arith.constant 0 : index
    %3 = vector.load %arg3[%c0_3, %c0_4] : memref<1x128xf32, #tpu.memory_space<vmem>>, vector<1x128xf32>
    %4 = vector.broadcast %3 : vector<1x128xf32> to vector<8x128xf32>
    %5 = arith.addf %2, %4 : vector<8x128xf32>
    %c0_5 = arith.constant 0 : index
    %c0_6 = arith.constant 0 : index
    %6 = vector.load %arg4[%c0_5, %c0_6] : memref<8x128xf32, #tpu.memory_space<vmem>>, vector<8x128xf32>
    tpu.vector_store %arg4[%c0_5, %c0_6], %5 {strides = array<i32>} : memref<8x128xf32, #tpu.memory_space<vmem>>, vector<8x128xf32>,
    return
  }
  func.func @transform_0(%arg0: i32) -> (i32, i32) {
    %c0_i32 = arith.constant 0 : i32
    %c0_i32_0 = arith.constant 0 : i32
    return %arg0, %c0_i32 : i32, i32
  }
  func.func @transform_1(%arg0: i32) -> (i32, i32) {
    %c0_i32 = arith.constant 0 : i32
    %c0_i32_0 = arith.constant 0 : i32
    %c0_i32_1 = arith.constant 0 : i32
    return %c0_i32, %c0_i32_0 : i32, i32
  }
  func.func @transform_2(%arg0: i32) -> (i32, i32) {
    %c0_i32 = arith.constant 0 : i32
    %c0_i32_0 = arith.constant 0 : i32
    %c0_i32_1 = arith.constant 0 : i32
    return %c0_i32, %c0_i32_0 : i32, i32
  }
  func.func @transform_3(%arg0: i32) -> (i32, i32) {
    %c0_i32 = arith.constant 0 : i32
    %c0_i32_0 = arith.constant 0 : i32
    return %arg0, %c0_i32 : i32, i32
  }
}

</mosaic_0001>

<bundles_post_ra>
// kernel: tpu_custom_call.1
= control target key start
LH: loop header
LB: loop body
LE: loop exit
PB: predicated region body
PF: predicated region fallthrough
CT: control target
= control target key end

     0   :  { %8 = vsyncpa [#allocation3], 0  ;;  %s411_s0 = inlined_call_operand.hbm [shape: f32[8,768], index: 0, kind: input, shape index: {}]   ;;  %s412_s1 = inlined_call_operand.hbm [shape: f32[768,128], index: 1, kind: input, shape index: {}]   ;;  %s413_s2 = inlined_call_operand.vmem [shape: f32[1,128], index: 2, kind: input, shape index: {}]   ;;  %s414_s3 = inlined_call_operand.hbm [shape: f32[8,128], index: 3, kind: output, shape index: {}]  }
   0x1   :  { %9 = vsyncpa [#allocation6], 0 }
   0x2   :  { %10 = vsyncpa [#allocation4], 0  ;;  %s16_s14 = sshll.u32 %s411_s0, 4  ;;  %s374_s15 = smov [#allocation2]   ;;  %s17_s14 = int_to_ptr.hbm [resolvable:$true] %s16_s14 }
   0x3   :  { %s18_s16 = sshll.u32 %s374_s15, 4  ;;  %s26_s19 = sshll.u32 %s412_s1, 4  ;;  %s19_s16 = int_to_ptr.vmem [resolvable:$true] %s18_s16  ;;  %s27_s19 = int_to_ptr.hbm [resolvable:$true] %s26_s19 }
   0x4   :  { %21 = dma.hbm_to_vmem [thread:$0]  %s17_s14, 768, %s19_s16, [#allocation3]  }
   0x5   :  { %s375_s20 = smov [#allocation5]   ;;  %s376_s22 = smov 128  }
   0x6   :  { %s28_s21 = sshll.u32 %s375_s20, 4  ;;  %s377_s23 = smov 8   ;;  %s29_s21 = int_to_ptr.vmem [resolvable:$true] %s28_s21 }
   0x7   :  { %34 = dma.hbm_to_vmem [thread:$0]  %s27_s19, 12288, %s29_s21, [#allocation6], %s376_s22, %s376_s22, %s377_s23  }
   0x8   :  { %368 = dma.done.wait [#allocation3], 768  }
   0x9   :  { %369 = vsyncadd [#allocation3], 4294966528 }
   0xa   :  { %370 = dma.done.wait [#allocation6], 12288  }
   0xb   :  { %371 = vsyncadd [#allocation6], 4294955008  ;;  %v66_v0 = vld [vmem:[#allocation5 + $0x78] sm:$0xff]  ;;  %v65_v1 = vld [vmem:[#allocation5 + $0x70] sm:$0xff]  ;;  %s378_s24 = smov [#allocation7]   ;;  %s279_s28 = sshll.u32 %s414_s3, 4  ;;  %s280_s28 = int_to_ptr.hbm [resolvable:$true] %s279_s28 }
   0xc   :  { %v82_v2 = vld [vmem:[#allocation5 + $0xf8] sm:$0xff]  ;;  %151 = vmatpush.msra.mxu0 %v66_v0  ;;  %v81_v3 = vld [vmem:[#allocation5 + $0xf0] sm:$0xff]  ;;  %v64_v4 = vld [vmem:[#allocation5 + $0x68] sm:$0xff]  ;;  %s277_s25 = sshll.u32 %s378_s24, 4  ;;  %s278_s25 = int_to_ptr.vmem [resolvable:$true] %s277_s25 }
   0xd   :  { %171 = vmatpush.msra.mxu1 %v82_v2  ;;  %v80_v5 = vld [vmem:[#allocation5 + $0xe8] sm:$0xff]  ;;  %v63_v6 = vld [vmem:[#allocation5 + $0x60] sm:$0xff]  ;;  %v62_v8 = vld [vmem:[#allocation5 + $0x58] sm:$0xff] }
   0xe   :  { %152 = vmatpush.msra.mxu0 %v65_v1  ;;  %v79_v7 = vld [vmem:[#allocation5 + $0xe0] sm:$0xff]  ;;  %v78_v9 = vld [vmem:[#allocation5 + $0xd8] sm:$0xff]  ;;  %v61_v10 = vld [vmem:[#allocation5 + $0x50] sm:$0xff] }
   0xf   :  { %172 = vmatpush.msra.mxu1 %v81_v3  ;;  %v98_v11 = vld [vmem:[#allocation5 + $0x178] sm:$0xff]  ;;  %v77_v12 = vld [vmem:[#allocation5 + $0xd0] sm:$0xff]  ;;  %v96_v15 = vld [vmem:[#allocation5 + $0x168] sm:$0xff] }
  0x10   :  { %153 = vmatpush.msra.mxu0 %v64_v4  ;;  %191 = vmatpush.msra.mxu2 %v98_v11  ;;  %v97_v13 = vld [vmem:[#allocation5 + $0x170] sm:$0xff]  ;;  %v114_v14 = vld [vmem:[#allocation5 + $0x1f8] sm:$0xff]  ;;  %v60_v17 = vld [vmem:[#allocation5 + $0x48] sm:$0xff] }
  0x11   :  { %173 = vmatpush.msra.mxu1 %v80_v5  ;;  %v113_v16 = vld [vmem:[#allocation5 + $0x1f0] sm:$0xff]  ;;  %v76_v18 = vld [vmem:[#allocation5 + $0xc8] sm:$0xff]  ;;  %211 = vmatpush.msra.mxu3 %v114_v14  ;;  %v95_v19 = vld [vmem:[#allocation5 + $0x160] sm:$0xff] }
  0x12   :  { %154 = vmatpush.msra.mxu0 %v63_v6  ;;  %192 = vmatpush.msra.mxu2 %v97_v13  ;;  %v112_v20 = vld [vmem:[#allocation5 + $0x1e8] sm:$0xff]  ;;  %v59_v21 = vld [vmem:[#allocation5 + $0x40] sm:$0xff]  ;;  %v94_v23 = vld [vmem:[#allocation5 + $0x158] sm:$0xff] }
  0x13   :  { %174 = vmatpush.msra.mxu1 %v79_v7  ;;  %v75_v22 = vld [vmem:[#allocation5 + $0xc0] sm:$0xff]  ;;  %212 = vmatpush.msra.mxu3 %v113_v16  ;;  %v58_v25 = vld [vmem:[#allocation5 + $0x38] sm:$0xff]  ;;  %v93_v27 = vld [vmem:[#allocation5 + $0x150] sm:$0xff] }
  0x14   :  { %155 = vmatpush.msra.mxu0 %v62_v8  ;;  %193 = vmatpush.msra.mxu2 %v96_v15  ;;  %v111_v24 = vld [vmem:[#allocation5 + $0x1e0] sm:$0xff]  ;;  %v74_v26 = vld [vmem:[#allocation5 + $0xb8] sm:$0xff]  ;;  %v57_v29 = vld [vmem:[#allocation5 + $0x30] sm:$0xff] }
  0x15   :  { %175 = vmatpush.msra.mxu1 %v78_v9  ;;  %213 = vmatpush.msra.mxu3 %v112_v20  ;;  %v110_v28 = vld [vmem:[#allocation5 + $0x1d8] sm:$0xff]  ;;  %v73_v30 = vld [vmem:[#allocation5 + $0xb0] sm:$0xff]  ;;  %v92_v31 = vld [vmem:[#allocation5 + $0x148] sm:$0xff] }
  0x16   :  { %156 = vmatpush.msra.mxu0 %v61_v10  ;;  %194 = vmatpush.msra.mxu2 %v95_v19  ;;  %v109_v32 = vld [vmem:[#allocation5 + $0x1d0] sm:$0xff]  ;;  %v56_v33 = vld [vmem:[#allocation5 + $0x28] sm:$0xff]  ;;  %v91_v35 = vld [vmem:[#allocation5 + $0x140] sm:$0xff] }
  0x17   :  { %176 = vmatpush.msra.mxu1 %v77_v12  ;;  %214 = vmatpush.msra.mxu3 %v111_v24  ;;  %v72_v34 = vld [vmem:[#allocation5 + $0xa8] sm:$0xff]  ;;  %v55_v37 = vld [vmem:[#allocation5 + $0x20] sm:$0xff]  ;;  %v90_v39 = vld [vmem:[#allocation5 + $0x138] sm:$0xff] }
  0x18   :  { %157 = vmatpush.msra.mxu0 %v60_v17  ;;  %195 = vmatpush.msra.mxu2 %v94_v23  ;;  %v108_v36 = vld [vmem:[#allocation5 + $0x1c8] sm:$0xff]  ;;  %v71_v38 = vld [vmem:[#allocation5 + $0xa0] sm:$0xff]  ;;  %v54_v41 = vld [vmem:[#allocation5 + $0x18] sm:$0xff] }
  0x19   :  { %177 = vmatpush.msra.mxu1 %v76_v18  ;;  %215 = vmatpush.msra.mxu3 %v110_v28  ;;  %v107_v40 = vld [vmem:[#allocation5 + $0x1c0] sm:$0xff]  ;;  %v70_v42 = vld [vmem:[#allocation5 + $0x98] sm:$0xff]  ;;  %v89_v43 = vld [vmem:[#allocation5 + $0x130] sm:$0xff] }
  0x1a   :  { %158 = vmatpush.msra.mxu0 %v59_v21  ;;  %196 = vmatpush.msra.mxu2 %v93_v27  ;;  %v106_v44 = vld [vmem:[#allocation5 + $0x1b8] sm:$0xff]  ;;  %v53_v45 = vld [vmem:[#allocation5 + $0x10] sm:$0xff]  ;;  %v88_v47 = vld [vmem:[#allocation5 + $0x128] sm:$0xff] }
  0x1b   :  { %178 = vmatpush.msra.mxu1 %v75_v22  ;;  %216 = vmatpush.msra.mxu3 %v109_v32  ;;  %v69_v46 = vld [vmem:[#allocation5 + $0x90] sm:$0xff]  ;;  %v52_v49 = vld [vmem:[#allocation5 + $0x8] sm:$0xff]  ;;  %v87_v51 = vld [vmem:[#allocation5 + $0x120] sm:$0xff] }
  0x1c   :  { %159 = vmatpush.msra.mxu0 %v58_v25  ;;  %197 = vmatpush.msra.mxu2 %v92_v31  ;;  %v105_v48 = vld [vmem:[#allocation5 + $0x1b0] sm:$0xff]  ;;  %v68_v50 = vld [vmem:[#allocation5 + $0x88] sm:$0xff]  ;;  %v51_v53 = vld [vmem:[#allocation5] sm:$0xff] }
  0x1d   :  { %179 = vmatpush.msra.mxu1 %v74_v26  ;;  %217 = vmatpush.msra.mxu3 %v108_v36  ;;  %v104_v52 = vld [vmem:[#allocation5 + $0x1a8] sm:$0xff]  ;;  %v67_v54 = vld [vmem:[#allocation5 + $0x80] sm:$0xff]  ;;  %v130_v55 = vld [vmem:[#allocation5 + $0x278] sm:$0xff] }
  0x1e   :  { %160 = vmatpush.msra.mxu0 %v57_v29  ;;  %198 = vmatpush.msra.mxu2 %v91_v35  ;;  %v146_v56 = vld [vmem:[#allocation5 + $0x2f8] sm:$0xff]  ;;  %v103_v58 = vld [vmem:[#allocation5 + $0x1a0] sm:$0xff]  ;;  %v129_v59 = vld [vmem:[#allocation5 + $0x270] sm:$0xff] }
  0x1f   :  { %180 = vmatpush.msra.mxu1 %v73_v30  ;;  %218 = vmatpush.msra.mxu3 %v107_v40  ;;  %v86_v57 = vld [vmem:[#allocation5 + $0x118] sm:$0xff]  ;;  %v145_v60 = vld [vmem:[#allocation5 + $0x2f0] sm:$0xff]  ;;  %v128_v63 = vld [vmem:[#allocation5 + $0x268] sm:$0xff] }
  0x20   :  { %161 = vmatpush.msra.mxu0 %v56_v33  ;;  %199 = vmatpush.msra.mxu2 %v90_v39  ;;  %v85_v61 = vld [vmem:[#allocation5 + $0x110] sm:$0xff]  ;;  %v102_v62 = vld [vmem:[#allocation5 + $0x198] sm:$0xff]  ;;  %v144_v0 = vld [vmem:[#allocation5 + $0x2e8] sm:$0xff] }
  0x21   :  { %181 = vmatpush.msra.mxu1 %v72_v34  ;;  %219 = vmatpush.msra.mxu3 %v106_v44  ;;  %v84_v1 = vld [vmem:[#allocation5 + $0x108] sm:$0xff]  ;;  %v101_v2 = vld [vmem:[#allocation5 + $0x190] sm:$0xff]  ;;  %v127_v3 = vld [vmem:[#allocation5 + $0x260] sm:$0xff] }
  0x22   :  { %162 = vmatpush.msra.mxu0 %v55_v37  ;;  %200 = vmatpush.msra.mxu2 %v89_v43  ;;  %v143_v4 = vld [vmem:[#allocation5 + $0x2e0] sm:$0xff]  ;;  %v100_v6 = vld [vmem:[#allocation5 + $0x188] sm:$0xff]  ;;  %v126_v7 = vld [vmem:[#allocation5 + $0x258] sm:$0xff] }
  0x23   :  { %182 = vmatpush.msra.mxu1 %v71_v38  ;;  %220 = vmatpush.msra.mxu3 %v105_v48  ;;  %v83_v5 = vld [vmem:[#allocation5 + $0x100] sm:$0xff]  ;;  %v142_v8 = vld [vmem:[#allocation5 + $0x2d8] sm:$0xff]  ;;  %v125_v11 = vld [vmem:[#allocation5 + $0x250] sm:$0xff] }
  0x24   :  { %163 = vmatpush.msra.mxu0 %v54_v41  ;;  %201 = vmatpush.msra.mxu2 %v88_v47  ;;  %v47_v9 = vld [vmem:[#allocation2 + $0x10] sm:$0xff]  ;;  %v141_v12 = vld [vmem:[#allocation5 + $0x2d0] sm:$0xff]  ;;  %v48_v14 = vld [vmem:[#allocation2 + $0x18] sm:$0xff] }
  0x25   :  { %183 = vmatpush.msra.mxu1 %v70_v42  ;;  %221 = vmatpush.msra.mxu3 %v104_v52  ;;  %v99_v10 = vld [vmem:[#allocation5 + $0x180] sm:$0xff]  ;;  %v45_v13 = vld [vmem:[#allocation2] sm:$0xff]  ;;  %v124_v15 = vld [vmem:[#allocation5 + $0x248] sm:$0xff] }
  0x26   :  { %164 = vmatpush.msra.mxu0 %v53_v45  ;;  %202 = vmatpush.msra.mxu2 %v87_v51  ;;  %v140_v16 = vld [vmem:[#allocation5 + $0x2c8] sm:$0xff]  ;;  %v46_v17 = vld [vmem:[#allocation2 + $0x8] sm:$0xff]  ;;  %v123_v18 = vld [vmem:[#allocation5 + $0x240] sm:$0xff] }
  0x27   :  { %184 = vmatpush.msra.mxu1 %v69_v46  ;;  %222 = vmatpush.msra.mxu3 %v103_v58  ;;  %v139_v19 = vld [vmem:[#allocation5 + $0x2c0] sm:$0xff]  ;;  %v122_v20 = vld [vmem:[#allocation5 + $0x238] sm:$0xff]  ;;  %v121_v22 = vld [vmem:[#allocation5 + $0x230] sm:$0xff] }
  0x28   :  { %165 = vmatpush.msra.mxu0 %v52_v49  ;;  %203 = vmatpush.msra.mxu2 %v86_v57  ;;  %v138_v21 = vld [vmem:[#allocation5 + $0x2b8] sm:$0xff]  ;;  %v137_v23 = vld [vmem:[#allocation5 + $0x2b0] sm:$0xff]  ;;  %v120_v24 = vld [vmem:[#allocation5 + $0x228] sm:$0xff] }
  0x29   :  { %185 = vmatpush.msra.mxu1 %v68_v50  ;;  %223 = vmatpush.msra.mxu3 %v102_v62  ;;  %v136_v25 = vld [vmem:[#allocation5 + $0x2a8] sm:$0xff]  ;;  %v119_v26 = vld [vmem:[#allocation5 + $0x220] sm:$0xff]  ;;  %v118_v28 = vld [vmem:[#allocation5 + $0x218] sm:$0xff] }
  0x2a   :  { %166 = vmatpush.msra.mxu0 %v51_v53  ;;  %204 = vmatpush.msra.mxu2 %v85_v61  ;;  %v135_v27 = vld [vmem:[#allocation5 + $0x2a0] sm:$0xff]  ;;  %v134_v29 = vld [vmem:[#allocation5 + $0x298] sm:$0xff]  ;;  %v117_v30 = vld [vmem:[#allocation5 + $0x210] sm:$0xff] }
  0x2b   :  { %186 = vmatpush.msra.mxu1 %v67_v54  ;;  %224 = vmatpush.msra.mxu3 %v101_v2  ;;  %v133_v31 = vld [vmem:[#allocation5 + $0x290] sm:$0xff]  ;;  %v116_v32 = vld [vmem:[#allocation5 + $0x208] sm:$0xff]  ;;  %v115_v34 = vld [vmem:[#allocation5 + $0x200] sm:$0xff] }
  0x2c   :  { %231 = vmatpush.msrb.mxu0 %v130_v55  ;;  %205 = vmatpush.msra.mxu2 %v84_v1  ;;  %v132_v33 = vld [vmem:[#allocation5 + $0x288] sm:$0xff]  ;;  %v131_v35 = vld [vmem:[#allocation5 + $0x280] sm:$0xff]  ;;  %v49_v36 = vld [vmem:[#allocation2 + $0x20] sm:$0xff] }
  0x2d   :  { %251 = vmatpush.msrb.mxu1 %v146_v56  ;;  %225 = vmatpush.msra.mxu3 %v100_v6  ;;  %v50_v37 = vld [vmem:[#allocation2 + $0x28] sm:$0xff]  ;;  %v295_v38 = vld [vmem:[%s413_s2] ss:$0 sm:$0xff] }
  0x2e   :  { %232 = vmatpush.msrb.mxu0 %v129_v59  ;;  %206 = vmatpush.msra.mxu2 %v83_v5 }
  0x2f   :  { %252 = vmatpush.msrb.mxu1 %v145_v60  ;;  %207 = vmatmul.f32.vlgmr.msra.gmra.mxu2 %v47_v9 }
  0x30   :  { %233 = vmatpush.msrb.mxu0 %v128_v63  ;;  %226 = vmatpush.msra.mxu3 %v99_v10 }
  0x31   :  { %253 = vmatpush.msrb.mxu1 %v144_v0  ;;  %167 = vmatmul.f32.vlgmr.msra.gmra.mxu0 %v45_v13 }
  0x32   :  { %234 = vmatpush.msrb.mxu0 %v127_v3  ;;  %227 = vmatmul.f32.vlgmr.msra.gmra.mxu3 %v48_v14 }
  0x33   :  { %254 = vmatpush.msrb.mxu1 %v143_v4 }
  0x34   :  { %235 = vmatpush.msrb.mxu0 %v126_v7  ;;  %187 = vmatmul.f32.vlgmr.msra.gmra.mxu1 %v46_v17 }
  0x35   :  { %255 = vmatpush.msrb.mxu1 %v142_v8 }
  0x36   :  { %236 = vmatpush.msrb.mxu0 %v125_v11 }
  0x37   :  { %256 = vmatpush.msrb.mxu1 %v141_v12 }
  0x38   :  { %237 = vmatpush.msrb.mxu0 %v124_v15 }
  0x39   :  { %257 = vmatpush.msrb.mxu1 %v140_v16 }
  0x3a   :  { %238 = vmatpush.msrb.mxu0 %v123_v18 }
  0x3b   :  { %258 = vmatpush.msrb.mxu1 %v139_v19 }
  0x3c   :  { %239 = vmatpush.msrb.mxu0 %v122_v20 }
  0x3d   :  { %259 = vmatpush.msrb.mxu1 %v138_v21 }
  0x3e   :  { %240 = vmatpush.msrb.mxu0 %v121_v22 }
  0x3f   :  { %260 = vmatpush.msrb.mxu1 %v137_v23 }
  0x40   :  { %241 = vmatpush.msrb.mxu0 %v120_v24 }
  0x41   :  { %261 = vmatpush.msrb.mxu1 %v136_v25 }
  0x42   :  { %242 = vmatpush.msrb.mxu0 %v119_v26 }
  0x43   :  { %262 = vmatpush.msrb.mxu1 %v135_v27 }
  0x44   :  { %243 = vmatpush.msrb.mxu0 %v118_v28 }
  0x45   :  { %263 = vmatpush.msrb.mxu1 %v134_v29 }
  0x46   :  { %244 = vmatpush.msrb.mxu0 %v117_v30 }
  0x47   :  { %264 = vmatpush.msrb.mxu1 %v133_v31 }
  0x48   :  { %245 = vmatpush.msrb.mxu0 %v116_v32 }
  0x49   :  { %265 = vmatpush.msrb.mxu1 %v132_v33 }
  0x4a   :  { %246 = vmatpush.msrb.mxu0 %v115_v34 }
  0x4b   :  { %266 = vmatpush.msrb.mxu1 %v131_v35  ;;  %247 = vmatmul.f32.vlgmr.msrb.gmra.mxu0 %v49_v36 }
  0x4c   :  { %267 = vmatmul.f32.vlgmr.msrb.gmra.mxu1 %v50_v37 }
  0xae   :  { %v168_v39 = vpop.f32.mrf.mxu0 }
  0xaf   :  { %v169_v40 = vadd.f32 %v295_v38, %v168_v39 }
  0xb1   :  { %v188_v41 = vpop.f32.mrf.mxu1 }
  0xb2   :  { %v189_v42 = vadd.f32 %v188_v41, %v169_v40  ;;  %v208_v43 = vpop.f32.mrf.mxu2 }
  0xb4   :  { %v209_v44 = vadd.f32 %v208_v43, %v189_v42 }
  0xb5   :  { %v228_v45 = vpop.f32.mrf.mxu3 }
  0xb6   :  { %v229_v46 = vadd.f32 %v228_v45, %v209_v44 }
  0xc8   :  { %v248_v47 = vpop.f32.mrf.mxu0 }
  0xc9   :  { %v268_v48 = vpop.f32.mrf.mxu1  ;;  %v249_v49 = vadd.f32 %v248_v47, %v229_v46 }
  0xcb   :  { %v269_v50 = vadd.f32 %v268_v48, %v249_v49 }
  0xcd   :  { %271 = vst [vmem:[#allocation7] sm:$0xff] %v269_v50 }
  0xce   :  { %282 = dma.vmem_to_hbm [thread:$0]  %s278_s25, 128, %s280_s28, [#allocation4]  }
  0xcf   :  { %372 = dma.done.wait [#allocation4], 128  }
  0xd0   :  { %373 = vsyncadd [#allocation4], 4294967168 }
  0xd1   :  { %287 = vsyncpa [#allocation3], 1 }
  0xd2   :  { %288 = vsyncpa [#allocation6], 1 }
  0xd3   :  { %289 = vsyncpa [#allocation4], 1 }

</bundles_post_ra>
